<compile_context>
chip_gen: v6e
topology: v6e:2x2x1
jax: 0.10.0
libtpu: 0.0.40
codegen_flags: <defaults>
</compile_context>

<pallas_src>
import functools

import jax
import jax.numpy as jnp
from jax.experimental import pallas as pl
from jax.experimental.pallas import tpu as pltpu


def _input_embedding_kernel(txt_ids_ref,   # SMEM (B*S,) int32  -- scalar prefetch
                            seg_ref,       # VMEM (TQ, 1) int32
                            pos_ref,       # VMEM (TQ, Dp) f32   (contiguous pos slice)
                            seg_tab_ref,   # VMEM (3, Dp) f32
                            tok_hbm,       # ANY/HBM (V, Dp) f32 (full token table)
                            out_ref,       # VMEM (TQ, Dp) f32
                            tok_buf,       # VMEM scratch (TQ, Dp) f32
                            sems,          # DMA semaphores (TQ,)
                            *, tq, seq_len, vocab):
    bi = pl.program_id(0)
    qi = pl.program_id(1)
    base = bi * seq_len + qi * tq  # flat row index of first row in this tile

    # ---- token gather: one row DMA per token, all issued before any wait ----
    @pl.loop(0, tq)
    def _start(r):
        tid = txt_ids_ref[base + r]
        # clamp untrusted ids so the DMA never reads out of the table
        tid = jnp.minimum(jnp.maximum(tid, 0), vocab - 1)
        pltpu.make_async_copy(tok_hbm.at[pl.ds(tid, 1), :],
                              tok_buf.at[pl.ds(r, 1), :],
                              sems.at[r]).start()

    @pl.loop(0, tq)
    def _wait(r):
        pltpu.make_async_copy(tok_hbm.at[pl.ds(0, 1), :],
                              tok_buf.at[pl.ds(r, 1), :],
                              sems.at[r]).wait()

    # ---- VPU add: token rows + positional slice + 3-way segment select ----
    tok = tok_buf[...]            # (TQ, Dp)
    pos = pos_ref[...]            # (TQ, Dp)
    seg_ids = seg_ref[...]        # (TQ, 1)
    row0 = seg_tab_ref[0:1, :]    # (1, Dp)
    row1 = seg_tab_ref[1:2, :]
    row2 = seg_tab_ref[2:3, :]
    seg_e = jnp.where(seg_ids == 0, row0,
                      jnp.where(seg_ids == 1, row1, row2))
    out_ref[...] = (tok + pos + seg_e).astype(out_ref.dtype)


def _pick_tq(s):
    """Largest sequence tile <= 128 rows that divides S (whole sequence if small)."""
    if s <= 128:
        return s
    best = 1
    for cand in range(8, 129, 8):
        if s % cand == 0:
            best = cand
    return best if best > 1 else s


def input_embedding(txt, seg, tok_table, pos_table, seg_table):
    """Pallas equivalent of InputEmbedding.forward(txt, seg).

    txt, seg: (B, S) int ids. Tables: (V, D), (S, D), (3, D) f32.
    Returns (B, S, D) f32.
    """
    b, s = txt.shape
    v, d = tok_table.shape
    dp = ((d + 127) // 128) * 128          # lane-dense last dim
    tq = _pick_tq(s)
    nq = s // tq

    pad = dp - d
    if pad:
        tok_p = jnp.pad(tok_table, ((0, 0), (0, pad)))
        pos_p = jnp.pad(pos_table, ((0, 0), (0, pad)))
        seg_p = jnp.pad(seg_table, ((0, 0), (0, pad)))
    else:
        tok_p, pos_p, seg_p = tok_table, pos_table, seg_table

    txt_flat = txt.reshape(-1).astype(jnp.int32)        # SMEM scalar prefetch
    seg3d = seg.reshape(b, s, 1).astype(jnp.int32)      # (B, S, 1) for row-wise select

    kernel = functools.partial(_input_embedding_kernel, tq=tq, seq_len=s, vocab=v)

    grid_spec = pltpu.PrefetchScalarGridSpec(
        num_scalar_prefetch=1,
        grid=(b, nq),
        in_specs=[
            pl.BlockSpec((None, tq, 1), lambda bi, qi, ids: (bi, qi, 0)),  # seg ids
            pl.BlockSpec((tq, dp), lambda bi, qi, ids: (qi, 0)),           # pos slice
            pl.BlockSpec((3, dp), lambda bi, qi, ids: (0, 0)),             # seg table
            pl.BlockSpec(memory_space=pl.ANY),                             # token table (HBM)
        ],
        out_specs=pl.BlockSpec((None, tq, dp), lambda bi, qi, ids: (bi, qi, 0)),
        scratch_shapes=[
            pltpu.VMEM((tq, dp), jnp.float32),      # gathered token rows
            pltpu.SemaphoreType.DMA((tq,)),         # one sem per in-flight row DMA
        ],
    )

    # explicit VMEM budget: double-buffered out + pos, ids, seg table, gather staging
    vmem_need = 4 * (2 * tq * dp + 2 * tq * dp + 2 * tq + 2 * 3 * dp + tq * dp) + (1 << 20)
    vmem_limit = int(min(48 * 1024 * 1024, max(vmem_need, 4 * 1024 * 1024)))

    out = pl.pallas_call(
        kernel,
        out_shape=jax.ShapeDtypeStruct((b, s, dp), jnp.float32),
        grid_spec=grid_spec,
        compiler_params=pltpu.CompilerParams(
            dimension_semantics=("parallel", "parallel"),
            vmem_limit_bytes=vmem_limit,
        ),
    )(txt_flat, seg3d, pos_p, seg_p, tok_p)

    return out[..., :d] if pad else out


def init_params(key, vocab_size, seq_length, d_model, pad_idx):
    """Deterministic init mirroring nn.Embedding (N(0,1)), padding rows zeroed."""
    k_tok, k_pos, k_seg = jax.random.split(key, 3)
    tok_table = jax.random.normal(k_tok, (vocab_size, d_model), dtype=jnp.float32)
    pos_table = jax.random.normal(k_pos, (seq_length, d_model), dtype=jnp.float32)
    seg_table = jax.random.normal(k_seg, (3, d_model), dtype=jnp.float32)
    tok_table = tok_table.at[pad_idx].set(0.0)
    seg_table = seg_table.at[pad_idx].set(0.0)
    return tok_table, pos_table, seg_table


if __name__ == "__main__":
    vocab_size = 64
    seq_length = 8
    d_model = 32
    pad_idx = 0
    batch = 2

    key = jax.random.PRNGKey(0)
    k_params, k_txt, k_seg = jax.random.split(key, 3)

    tok_table, pos_table, seg_table = init_params(
        k_params, vocab_size, seq_length, d_model, pad_idx)

    txt = jax.random.randint(k_txt, (batch, seq_length), 0, vocab_size, dtype=jnp.int32)
    seg = jax.random.randint(k_seg, (batch, seq_length), 0, 3, dtype=jnp.int32)

    out = input_embedding(txt, seg, tok_table, pos_table, seg_table)
    out = jax.block_until_ready(out)

    # Pure-JAX reference (same semantics as the PyTorch forward).
    ref = (tok_table[txt]
           + pos_table[jnp.arange(seq_length)][None, :, :]
           + seg_table[seg])
    assert out.shape == (batch, seq_length, d_model)
    assert jnp.allclose(out, ref, atol=1e-5), "mismatch vs reference"

    print("KERNEL_OK")
</pallas_src>

<mosaic_0001>
module attributes {stable_mosaic.version = 11 : i64} {
  func.func @_input_embedding_kernel(%arg0: i32, %arg1: i32, %arg2: memref<16xi32, #tpu.memory_space<smem>>, %arg3: memref<1x8x1xi32, #tpu.memory_space<vmem>>, %arg4: memref<8x128xf32, #tpu.memory_space<vmem>>, %arg5: memref<3x128xf32, #tpu.memory_space<vmem>>, %arg6: memref<64x128xf32, #tpu.memory_space<any>>, %arg7: memref<1x8x128xf32, #tpu.memory_space<vmem>>, %arg8: memref<8x128xf32, #tpu.memory_space<vmem>>, %arg9: memref<8x!tpu.dma_semaphore, #tpu.memory_space<semaphore_mem>>) attributes {dimension_semantics = [#tpu.dimension_semantics<parallel>, #tpu.dimension_semantics<parallel>], iteration_bounds = array<i64: 2, 1>, scalar_prefetch = 1 : i64, scratch_operands = 2 : i64, tpu.core_type = #tpu.core_type<tc>, window_params = [{transform_indices = @transform_0, window_bounds = array<i64: 1, 8, 1>}, {transform_indices = @transform_1, window_bounds = array<i64: 8, 128>}, {pipeline_mode = #tpu.pipeline_mode<synchronous>, transform_indices = @transform_2, window_bounds = array<i64: 3, 128>}, {}, {transform_indices = @transform_4, window_bounds = array<i64: 1, 8, 128>}]} {
    %c8_i32 = arith.constant 8 : i32
    %0 = arith.muli %arg0, %c8_i32 : i32
    %c8_i32_0 = arith.constant 8 : i32
    %1 = arith.muli %arg1, %c8_i32_0 : i32
    %2 = arith.addi %0, %1 : i32
    %c0_i32 = arith.constant 0 : i32
    %c8_i32_1 = arith.constant 8 : i32
    %3 = arith.addi %c0_i32, %c8_i32_1 : i32
    %c1_i32 = arith.constant 1 : i32
    scf.for %arg10 = %c0_i32 to %3 step %c1_i32  : i32 {
      %c1_i32_22 = arith.constant 1 : i32
      %33 = arith.muli %arg10, %c1_i32_22 : i32
      %c0_i32_23 = arith.constant 0 : i32
      %34 = arith.addi %c0_i32_23, %33 : i32
      %35 = arith.addi %2, %34 : i32
      %36 = arith.index_cast %35 : i32 to index
      %37 = memref.load %arg2[%36] : memref<16xi32, #tpu.memory_space<smem>>
      %c0_i32_24 = arith.constant 0 : i32
      %38 = arith.maxsi %37, %c0_i32_24 : i32
      %c63_i32 = arith.constant 63 : i32
      %39 = arith.minsi %38, %c63_i32 : i32
      %c0_i32_25 = arith.constant 0 : i32
      %40 = tpu.memref_slice %arg6[%39, %c0_i32_25] : memref<64x128xf32, #tpu.memory_space<any>> -> memref<1x128xf32, #tpu.memory_space<any>>
      %c0_i32_26 = arith.constant 0 : i32
      %41 = tpu.memref_slice %arg8[%34, %c0_i32_26] : memref<8x128xf32, #tpu.memory_space<vmem>> -> memref<1x128xf32, #tpu.memory_space<vmem>>
      %42 = tpu.memref_slice %arg9[%34] : memref<8x!tpu.dma_semaphore, #tpu.memory_space<semaphore_mem>> -> memref<1x!tpu.dma_semaphore, #tpu.memory_space<semaphore_mem>>
      %43 = tpu.memref_squeeze %42 : memref<1x!tpu.dma_semaphore, #tpu.memory_space<semaphore_mem>> -> memref<!tpu.dma_semaphore, #tpu.memory_space<semaphore_mem>>
      tpu.enqueue_dma source(%40 : memref<1x128xf32, #tpu.memory_space<any>>) target(%41 : memref<1x128xf32, #tpu.memory_space<vmem>>) target_semaphore(%43 : memref<!tpu.dma_semaphore, #tpu.memory_space<semaphore_mem>>)
    }
    %c8_i32_2 = arith.constant 8 : i32
    %c0_i32_3 = arith.constant 0 : i32
    %c8_i32_4 = arith.constant 8 : i32
    %4 = arith.addi %c0_i32_3, %c8_i32_4 : i32
    %c1_i32_5 = arith.constant 1 : i32
    scf.for %arg10 = %c0_i32_3 to %4 step %c1_i32_5  : i32 {
      %c1_i32_22 = arith.constant 1 : i32
      %33 = arith.muli %arg10, %c1_i32_22 : i32
      %c0_i32_23 = arith.constant 0 : i32
      %34 = arith.addi %c0_i32_23, %33 : i32
      %c0_i32_24 = arith.constant 0 : i32
      %c0_i32_25 = arith.constant 0 : i32
      %35 = tpu.memref_slice %arg6[%c0_i32_24, %c0_i32_25] : memref<64x128xf32, #tpu.memory_space<any>> -> memref<1x128xf32, #tpu.memory_space<any>>
      %c0_i32_26 = arith.constant 0 : i32
      %36 = tpu.memref_slice %arg8[%34, %c0_i32_26] : memref<8x128xf32, #tpu.memory_space<vmem>> -> memref<1x128xf32, #tpu.memory_space<vmem>>
      %37 = tpu.memref_slice %arg9[%34] : memref<8x!tpu.dma_semaphore, #tpu.memory_space<semaphore_mem>> -> memref<1x!tpu.dma_semaphore, #tpu.memory_space<semaphore_mem>>
      %38 = tpu.memref_squeeze %37 : memref<1x!tpu.dma_semaphore, #tpu.memory_space<semaphore_mem>> -> memref<!tpu.dma_semaphore, #tpu.memory_space<semaphore_mem>>
      tpu.wait_dma2 semaphore(%38 : memref<!tpu.dma_semaphore, #tpu.memory_space<semaphore_mem>>) src(%35 : memref<1x128xf32, #tpu.memory_space<any>>) dst(%36 : memref<1x128xf32, #tpu.memory_space<vmem>>)
    }
    %c8_i32_6 = arith.constant 8 : i32
    %c0 = arith.constant 0 : index
    %c0_7 = arith.constant 0 : index
    %5 = vector.load %arg8[%c0, %c0_7] : memref<8x128xf32, #tpu.memory_space<vmem>>, vector<8x128xf32>
    %c0_8 = arith.constant 0 : index
    %c0_9 = arith.constant 0 : index
    %6 = vector.load %arg4[%c0_8, %c0_9] : memref<8x128xf32, #tpu.memory_space<vmem>>, vector<8x128xf32>
    %c0_10 = arith.constant 0 : index
    %c0_11 = arith.constant 0 : index
    %c0_12 = arith.constant 0 : index
    %7 = vector.load %arg3[%c0_10, %c0_11, %c0_12] : memref<1x8x1xi32, #tpu.memory_space<vmem>>, vector<1x8x1xi32>
    %8 = vector.shape_cast %7 : vector<1x8x1xi32> to vector<8x1xi32>
    %c0_13 = arith.constant 0 : index
    %c0_14 = arith.constant 0 : index
    %9 = vector.load %arg5[%c0_13, %c0_14] : memref<3x128xf32, #tpu.memory_space<vmem>>, vector<1x128xf32>
    %c1 = arith.constant 1 : index
    %c0_15 = arith.constant 0 : index
    %10 = vector.load %arg5[%c1, %c0_15] : memref<3x128xf32, #tpu.memory_space<vmem>>, vector<1x128xf32>
    %c2 = arith.constant 2 : index
    %c0_16 = arith.constant 0 : index
    %11 = vector.load %arg5[%c2, %c0_16] : memref<3x128xf32, #tpu.memory_space<vmem>>, vector<1x128xf32>
    %c0_i32_17 = arith.constant 0 : i32
    %12 = vector.broadcast %c0_i32_17 : i32 to vector<8x1xi32>
    %13 = arith.cmpi eq, %8, %12 : vector<8x1xi32>
    %c1_i32_18 = arith.constant 1 : i32
    %14 = vector.broadcast %c1_i32_18 : i32 to vector<8x1xi32>
    %15 = arith.cmpi eq, %8, %14 : vector<8x1xi32>
    %16 = vector.shape_cast %15 : vector<8x1xi1> to vector<8x1xi1>
    %17 = vector.broadcast %16 : vector<8x1xi1> to vector<8x128xi1>
    %18 = vector.shape_cast %10 : vector<1x128xf32> to vector<1x128xf32>
    %19 = vector.broadcast %18 : vector<1x128xf32> to vector<8x128xf32>
    %20 = vector.shape_cast %11 : vector<1x128xf32> to vector<1x128xf32>
    %21 = vector.broadcast %20 : vector<1x128xf32> to vector<8x128xf32>
    %22 = arith.select %17, %19, %21 : vector<8x128xi1>, vector<8x128xf32>
    %23 = vector.shape_cast %13 : vector<8x1xi1> to vector<8x1xi1>
    %24 = vector.broadcast %23 : vector<8x1xi1> to vector<8x128xi1>
    %25 = vector.shape_cast %9 : vector<1x128xf32> to vector<1x128xf32>
    %26 = vector.broadcast %25 : vector<1x128xf32> to vector<8x128xf32>
    %27 = arith.select %24, %26, %22 : vector<8x128xi1>, vector<8x128xf32>
    %28 = arith.addf %5, %6 : vector<8x128xf32>
    %29 = arith.addf %28, %27 : vector<8x128xf32>
    %c0_19 = arith.constant 0 : index
    %c0_20 = arith.constant 0 : index
    %c0_21 = arith.constant 0 : index
    %30 = vector.load %arg7[%c0_19, %c0_20, %c0_21] : memref<1x8x128xf32, #tpu.memory_space<vmem>>, vector<1x8x128xf32>
    %31 = vector.shape_cast %30 : vector<1x8x128xf32> to vector<8x128xf32>
    %32 = vector.shape_cast %29 : vector<8x128xf32> to vector<1x8x128xf32>
    tpu.vector_store %arg7[%c0_19, %c0_20, %c0_21], %32 {strides = array<i32>} : memref<1x8x128xf32, #tpu.memory_space<vmem>>, vector<1x8x128xf32>,
    return
  }
  func.func @transform_0(%arg0: i32, %arg1: i32, %arg2: memref<16xi32, #tpu.memory_space<smem>>) -> (i32, i32, i32) {
    %c0_i32 = arith.constant 0 : i32
    %c0_i32_0 = arith.constant 0 : i32
    return %arg0, %arg1, %c0_i32 : i32, i32, i32
  }
  func.func @transform_1(%arg0: i32, %arg1: i32, %arg2: memref<16xi32, #tpu.memory_space<smem>>) -> (i32, i32) {
    %c0_i32 = arith.constant 0 : i32
    %c0_i32_0 = arith.constant 0 : i32
    return %arg1, %c0_i32 : i32, i32
  }
  func.func @transform_2(%arg0: i32, %arg1: i32, %arg2: memref<16xi32, #tpu.memory_space<smem>>) -> (i32, i32) {
    %c0_i32 = arith.constant 0 : i32
    %c0_i32_0 = arith.constant 0 : i32
    %c0_i32_1 = arith.constant 0 : i32
    return %c0_i32, %c0_i32_0 : i32, i32
  }
  func.func @transform_4(%arg0: i32, %arg1: i32, %arg2: memref<16xi32, #tpu.memory_space<smem>>) -> (i32, i32, i32) {
    %c0_i32 = arith.constant 0 : i32
    %c0_i32_0 = arith.constant 0 : i32
    return %arg0, %arg1, %c0_i32 : i32, i32, i32
  }
}

</mosaic_0001>

<bundles_post_ra>
// kernel: tpu_custom_call.1
= control target key start
LH: loop header
LB: loop body
LE: loop exit
PB: predicated region body
PF: predicated region fallthrough
CT: control target
= control target key end

     0   :  { %s885_s0 = inlined_call_operand.vmem [shape: s32[16], index: 0, kind: input, shape index: {}]   ;;  %s886_s1 = inlined_call_operand.vmem [shape: s32[2,8,1], index: 1, kind: input, shape index: {}]   ;;  %s887_s2 = inlined_call_operand.vmem [shape: f32[8,128], index: 2, kind: input, shape index: {}]   ;;  %s888_s3 = inlined_call_operand.vmem [shape: f32[3,128], index: 3, kind: input, shape index: {}]   ;;  %s889_s4 = inlined_call_operand.hbm [shape: f32[64,128], index: 4, kind: input, shape index: {}]   ;;  %s890_s5 = inlined_call_operand.hbm [shape: f32[2,8,128], index: 5, kind: output, shape index: {}]  }
   0x1   :  { %892 = sst [smem:[#allocation15_spill]] %s886_s1  ;;  %s10_s20 = sshll.u32 %s885_s0, 4  ;;  %s11_s20 = int_to_ptr.vmem [resolvable:$true] %s10_s20 }
   0x2   :  { %s568_s21 = scalar_lea.vmem %s11_s20, 16  ;;  %p573_p1 = scmp.lt.s32.totalorder %s11_s20, %s11_s20 }
   0x3   :  { %p569_p0 = scmp.ne.s32.totalorder %s11_s20, %s568_s21  ;;  %p574_p2 = scmp.lt.s32.totalorder %s568_s21, %s568_s21 }
   0x5   :  { %p575_p3 = por %p574_p2, %p573_p1 }
   0x7   :  { %p576_p4 = pnand %p575_p3, %p569_p0 }
   0x9   :  { %579 = shalt.err (!%p576_p4)  }
   0xa   :  { %s700_s22 = smov [#allocation5]  }
   0xb   :  { %13 = dma.vmem_to_smem %s11_s20, 16, %s700_s22, [#allocation4] }
   0xc   :  { %660 = dma.done.wait [#allocation4], 16 }
   0xd   :  { %661 = vsyncadd [#allocation4], 4294967280 }
   0xe   :  { %15 = sfence }
   0xf   :  { %16 = vsyncpa [#allocation7], 0 }
  0x10   :  { %18 = vsyncpa [#allocation7 + $0x1], 0  ;;  %s737_s23 = smov 0   ;;  %s739_s24 = smov 0  }
  0x11   :  { %s741_s0 = smov 0   ;;  %s743_s25 = smov 0  }
  0x12   :  { %s745_s26 = smov 0   ;;  %s747_s27 = smov 0  }
  0x13 LB: > { %s462_s28 = sadd.s32 4294967295, %s690_s27   ;;  %s463_s29 = sadd.s32 4294967294, %s690_s27   ;;  %s690_s27 = sphi %s747_s27, %s24_s27   ;;  %s686_s26 = sphi %s745_s26, %s904_s26   ;;  %s682_s25 = sphi %s743_s25, %s903_s25   ;;  %s678_s0 = sphi %s741_s0, %s902_s0   ;;  %s674_s24 = sphi %s739_s24, %s901_s24   ;;  %s670_s23 = sphi %s737_s23, %s900_s23  }
  0x14   : > { %s36_s30 = sadd.s32 1, %s686_s26  ;;  %s120_s6 = sadd.s32 1, %s678_s0 }
  0x15   : > { %p38_p5 = scmp.ge.s32.totalorder %s36_s30, 2  ;;  %p130_p6 = scmp.ne.s32.totalorder %s678_s0, %s674_s24 }
  0x16   : > { %p131_p7 = scmp.eq.s32.totalorder %s462_s28, 1  ;;  %p136_p8 = scmp.ne.s32.totalorder %s674_s24, %s670_s23 }
  0x17   : > { %s906_s30 = smov (%p38_p5, %s36_s30), 0  ;;  %p137_p10 = scmp.eq.s32.totalorder %s463_s29, 1 }
  0x18   : > { %p777_p9 = por %p131_p7, %p130_p6  ;;  %s115_s8 = ssub.s32 %s686_s26, %s906_s30 }
  0x19   : > { %p467_p11 = scmp.ge.s32.totalorder %s690_s27, 1  ;;  %p118_p12 = scmp.eq.s32.totalorder %s115_s8, 0 }
  0x1a   : > { %p784_p13 = por %p137_p10, %p136_p8  ;;  %p175_p0 = scmp.lt.s32.totalorder %s690_s27, 3 }
  0x1b   : > { %s790_s10 = scalar_select %p118_p12, %s678_s0, %s120_s6  }
  0x1c   : > { %p176_p1 = pnand %p467_p11, %p175_p0 }
  0x1d   : > { %s891_s11 = sand.u32 (!%p176_p1), 1, %s674_s24   ;;  %p205_p2 = scmp.lt.s32.totalorder (!%p176_p1), %s682_s25, 1 }
  0x1e   : > { %179 = sbr.rel (%p176_p1) target bundleno = 232 (0xe8), region = 32  ;;  %s796_s12 = sshll.u32 (!%p176_p1), %s891_s11, 3 }
  0x1f   : > { %s895_s1 = sld [smem:[#allocation15_spill]] (!%p176_p1)  ;;  %s806_s20 = smov (!%p176_p1), 0  }
  0x23   : > { %s206_s14 = scalar_select %p205_p2, %s682_s25, 1 }
  0x25   : > { %s469_s15 = sshll.u32 %s206_s14, 3 }
  0x26   : > { %s803_s18 = scalar_lea.vmem %s895_s1, %s469_s15 }
  0x27 LB: >> { %s896_s13 = sshll.u32 %s682_s25, 3  ;;  %s233_s28 = scalar_lea.vmem [#allocation2], %s694_s20  ;;  %s694_s20 = sphi %s806_s20, %s224_s20  }
  0x28   : >> { %s225_s21 = sadd.s32 %s694_s20, %s896_s13  ;;  %s242_s29 = sshll.u32 %s233_s28, 4  ;;  %s243_s29 = int_to_ptr.vmem [resolvable:$true] %s242_s29 }
  0x29   : >> { %s226_s22 = sld [smem:[#allocation5 + %s225_s21]]  ;;  %s234_s16 = scalar_lea.sflag [#allocation3], %s694_s20 }
  0x2a   : >> { %s582_s13 = scalar_lea.hbm %s889_s4, 1024 }
  0x2f   : >> { %p227_p3 = scmp.gt.s32.totalorder %s226_s22, 0  ;;  %p471_p4 = scmp.lt.s32.totalorder %s226_s22, 63 }
  0x31   : >> { %s908_s22 = smov (!%p227_p3, %s226_s22), 0 }
  0x32   : >> { %s910_s22 = smov (!%p471_p4, %s908_s22), 63 }
  0x33   : >> { %s476_s6 = sshll.u32 %s910_s22, 4 }
  0x34   : >> { %s232_s15 = scalar_lea.hbm %s889_s4, %s476_s6 }
  0x35   : >> { %s580_s17 = scalar_lea.hbm %s232_s15, 16  ;;  %p583_p6 = scmp.lt.s32.totalorder %s232_s15, %s889_s4 }
  0x36   : >> { %p581_p5 = scmp.ne.s32.totalorder %s232_s15, %s580_s17  ;;  %p584_p7 = scmp.lt.s32.totalorder %s582_s13, %s580_s17 }
  0x38   : >> { %p585_p8 = por %p584_p7, %p583_p6 }
  0x3a   : >> { %p586_p10 = pnand %p585_p8, %p581_p5 }
  0x3c   : >> { %589 = shalt.err (!%p586_p10)  }
  0x3d   : >> { %s590_s22 = scalar_lea.vmem %s243_s29, 16  ;;  %s701_s28 = smov [#allocation2]  }
  0x3e   : >> { %p591_p11 = scmp.ne.s32.totalorder %s243_s29, %s590_s22  ;;  %s592_s8 = sshll.u32 %s701_s28, 4  ;;  %s593_s8 = int_to_ptr.vmem [resolvable:$false] %s592_s8 }
  0x3f   : >> { %s594_s6 = scalar_lea.vmem %s593_s8, 128  ;;  %p595_p12 = scmp.lt.s32.totalorder %s243_s29, %s593_s8 }
  0x40   : >> { %p596_p0 = scmp.lt.s32.totalorder %s594_s6, %s590_s22 }
  0x42   : >> { %p597_p1 = por %p596_p0, %p595_p12 }
  0x44   : >> { %p598_p2 = pnand %p597_p1, %p591_p11 }
  0x46   : >> { %601 = shalt.err (!%p598_p2)  }
  0x47   : >> { %245 = dma.hbm_to_vmem [thread:$0]  %s232_s15, 16, %s243_s29, %s234_s16 }
  0x48   : >> { %s224_s20 = sadd.s32 1, %s694_s20  }
  0x49   : >> { %p221_p3 = scmp.ge.s32.totalorder %s224_s20, 8  }
  0x4a   : > { %s696_s1 = smov (%p221_p3), 0  }
  0x4b   : > { %223 = sbr.rel (!%p221_p3) target bundleno = 39 (0x27), region = 99 }
  0x50 LB: >> { %s252_s11 = scalar_lea.sflag [#allocation3], %s698_s1  ;;  %s698_s1 = sphi %s696_s1, %s251_s1  }
  0x51   : >> { %662 = dma.done.wait %s252_s11, 16 }
  0x52   : >> { %663 = vsyncadd %s252_s11, 4294967280  ;;  %s251_s1 = sadd.s32 1, %s698_s1  }
  0x53   : >> { %p248_p4 = scmp.ge.s32.totalorder %s251_s1, 8  }
  0x54   : > { %v258_v0 = vld [vmem:[%s803_s18] sm:$0xff] (%p248_p4)  ;;  %v702_v1 = vmov (%p248_p4), 0   ;;  %s481_s17 = sshll.u32 (%p248_p4), %s682_s25, 7  ;;  %s897_s21 = scalar_lea.vmem (%p248_p4), [#allocation6], %s796_s12 }
  0x55   : > { %250 = sbr.rel (!%p248_p4) target bundleno = 80 (0x50), region = 110  ;;  %567 = vset.pattern.permute.xlu0 (%p248_p4), %v702_v1  ;;  %vm263_vm0 = vcmp.eq.s32.totalorder (%p248_p4), %v258_v0, 1  ;;  %vm262_vm1 = vcmp.eq.s32.totalorder (%p248_p4), %v258_v0, 0  ;;  %v256_v5 = vld [vmem:[#allocation2] sm:$0xff] (%p248_p4)  ;;  %s306_s22 = sshll.u32 (%p248_p4), %s897_s21, 4  ;;  %s307_s22 = int_to_ptr.vmem [resolvable:$true] %s306_s22 }
  0x56   : > { %v264_v2 = vsel (%p248_p4), %vm263_vm0, 1, %v702_v1  ;;  %v278_v3 = vsel (%p248_p4), %vm262_vm1, 1, %v702_v1  ;;  %v257_v6 = vld [vmem:[%s887_s2] sm:$0xff] (%p248_p4)  ;;  %s304_s6 = scalar_lea.hbm (%p248_p4), %s890_s5, %s481_s17  ;;  %s898_s1 = smov (%p248_p4), %s897_s21 }
  0x57   : > { %266 = vperm.xlu0 (%p248_p4), %567, %v264_v2   ;;  %v477_v7 = vld [vmem:[%s888_s3 + $0x1] ss:$0 sm:$0xff] (%p248_p4)  ;;  %v478_v8 = vld [vmem:[%s888_s3 + $0x2] ss:$0 sm:$0xff] (%p248_p4)  ;;  %v479_v9 = vld [vmem:[%s888_s3] ss:$0 sm:$0xff] (%p248_p4)  ;;  %v288_v10 = vadd.f32 (%p248_p4), %v257_v6, %v256_v5 }
  0x58   : > { %s899_s11 = sand.u32 (%p248_p4), 1, %s674_s24   ;;  %s602_s19 = scalar_lea.vmem (%p248_p4), %s307_s22, 128 }
  0x59   : > { %s292_s13 = scalar_lea.sflag (%p248_p4), [#allocation7], %s899_s11  ;;  %p603_p5 = scmp.ne.s32.totalorder (%p248_p4), %s307_s22, %s602_s19 }
  0x5a   : > { %s703_s25 = smov [#allocation6]  }
  0x5b   : > { %280 = vperm.xlu0 %567, %v278_v3   ;;  %p604_p6 = pnand %p603_p5, %p777_p9  ;;  %s606_s20 = sshll.u32 %s703_s25, 4  ;;  %s607_s20 = int_to_ptr.vmem [resolvable:$false] %s606_s20 }
  0x5c   : > { %s608_s29 = scalar_lea.vmem %s607_s20, 256  ;;  %p609_p8 = scmp.lt.s32.totalorder %s307_s22, %s607_s20 }
  0x5d   : > { %p605_p7 = pneg %p604_p6  ;;  %p610_p10 = scmp.lt.s32.totalorder %s608_s29, %s602_s19 }
  0x5f   : > { %p611_p11 = por %p610_p10, %p609_p8 }
  0x61   : > { %p612_p12 = pnand %p611_p11, %p605_p7 }
  0xd2   : > { %v267_v4 = vpop.permute.xlu0 %266 }
  0xd3   : > { %vm268_vm2 = vcmp.eq.s32.totalorder %v267_v4, 1 }
  0xd4   : > { %v277_v12 = vsel %vm268_vm2, %v477_v7, %v478_v8 }
  0xd6   : > { %v281_v11 = vpop.permute.xlu0 %280 }
  0xd7   : > { %vm282_vm3 = vcmp.eq.s32.totalorder %v281_v11, 1 }
  0xd8   : > { %v287_v13 = vsel %vm282_vm3, %v479_v9, %v277_v12 }
  0xd9   : > { %v289_v14 = vadd.f32 %v288_v10, %v287_v13 }
  0xdb   : > { %290 = vst [vmem:[%s898_s1] sm:$0xff] %v289_v14 }
  0xdc   : > { %615 = shalt.err (!%p612_p12)
}
  0xdd   : > { %s616_s18 = scalar_lea.hbm %s304_s6, 128  ;;  %s620_s15 = scalar_lea.hbm %s890_s5, 256 }
  0xde   : > { %p617_p0 = scmp.ne.s32.totalorder %s304_s6, %s616_s18  ;;  %p621_p3 = scmp.lt.s32.totalorder %s304_s6, %s890_s5 }
  0xdf   : > { %p622_p4 = scmp.lt.s32.totalorder %s620_s15, %s616_s18 }
  0xe0   : > { %p618_p1 = pnand %p617_p0, %p777_p9 }
  0xe1   : > { %p623_p5 = por %p622_p4, %p621_p3 }
  0xe2   : > { %p619_p2 = pneg %p618_p1 }
  0xe4   : > { %p624_p6 = pnand %p623_p5, %p619_p2 }
  0xe6   : > { %627 = shalt.err (!%p624_p6)
}
  0xe7   : > { %494 = dma.vmem_to_hbm [thread:$0]  (%p777_p9), %s307_s22, 128, %s304_s6, %s292_s13  }
  0xe8 PF: > { %p500_p7 = scmp.ge.s32.totalorder %s690_s27, 2  ;;  %s318_s21 = sand.u32 1, %s670_s23  }
  0xe9   : > { %s319_s28 = scalar_lea.sflag [#allocation7], %s318_s21 }
  0xea   : > { %p497_p8 = pnand %p500_p7, %p784_p13 }
  0xec   : > { %p498_p10 = pneg %p497_p8 }
  0xee   : > { %665 = dma.done.wait (%p498_p10), %s319_s28, 128  }
  0xef   : > { %667 = vsyncadd (%p498_p10), %s319_s28, 4294967168  ;;  %s24_s27 = sadd.s32 1, %s690_s27   ;;  %s900_s23 = smov %s674_s24 }
  0xf0   : > { %p21_p11 = scmp.ge.s32.totalorder %s24_s27, 4   ;;  %s901_s24 = smov %s678_s0 }
  0xf1   : > { %s902_s0 = smov %s790_s10  ;;  %s903_s25 = smov %s686_s26 }
  0xf2   : > { %s904_s26 = smov %s906_s30  ;;  %23 = sbr.rel (!%p21_p11) target bundleno = 19 (0x13), region = 121 }
  0xf7   :  { %324 = vsyncpa [#allocation7], 1 }
  0xf8   :  { %326 = vsyncpa [#allocation7 + $0x1], 1 }
  0xf9   :  { %327 = vsyncmov [#allocation3] }
  0xfc   :  { %s328_s7 = vpop.sfrf %327 }
  0xfd   :  { %p484_p9 = scmp.ne.s32.totalorder %s328_s7, 0 }
  0xff   :  { %332 = shalt.err (%p484_p9)  }
 0x100   :  { %334 = vsyncmov [#allocation3 + $0x1] }
 0x103   :  { %s335_s9 = vpop.sfrf %334 }
 0x104   :  { %p485_p13 = scmp.ne.s32.totalorder %s335_s9, 0 }
 0x106   :  { %339 = shalt.err (%p485_p13)  }
 0x107   :  { %341 = vsyncmov [#allocation3 + $0x2] }
 0x10a   :  { %s342_s22 = vpop.sfrf %341 }
 0x10b   :  { %p486_p12 = scmp.ne.s32.totalorder %s342_s22, 0 }
 0x10d   :  { %346 = shalt.err (%p486_p12)  }
 0x10e   :  { %348 = vsyncmov [#allocation3 + $0x3] }
 0x111   :  { %s349_s10 = vpop.sfrf %348 }
 0x112   :  { %p487_p0 = scmp.ne.s32.totalorder %s349_s10, 0 }
 0x114   :  { %353 = shalt.err (%p487_p0)  }
 0x115   :  { %355 = vsyncmov [#allocation3 + $0x4] }
 0x118   :  { %s356_s27 = vpop.sfrf %355 }
 0x119   :  { %p488_p1 = scmp.ne.s32.totalorder %s356_s27, 0 }
 0x11b   :  { %360 = shalt.err (%p488_p1)  }
 0x11c   :  { %362 = vsyncmov [#allocation3 + $0x5] }
 0x11f   :  { %s363_s2 = vpop.sfrf %362 }
 0x120   :  { %p489_p2 = scmp.ne.s32.totalorder %s363_s2, 0 }
 0x122   :  { %367 = shalt.err (%p489_p2)  }
 0x123   :  { %369 = vsyncmov [#allocation3 + $0x6] }
 0x126   :  { %s370_s3 = vpop.sfrf %369 }
 0x127   :  { %p490_p3 = scmp.ne.s32.totalorder %s370_s3, 0 }
 0x129   :  { %374 = shalt.err (%p490_p3)  }
 0x12a   :  { %376 = vsyncmov [#allocation3 + $0x7] }
 0x12d   :  { %s377_s4 = vpop.sfrf %376 }
 0x12e   :  { %p491_p4 = scmp.ne.s32.totalorder %s377_s4, 0 }
 0x130   :  { %381 = shalt.err (%p491_p4)  }

</bundles_post_ra>
